<compile_context>
chip_gen: v6e
topology: v6e:2x2x1
jax: 0.10.0
libtpu: 0.0.40
codegen_flags: <defaults>
</compile_context>

<pallas_src>
import math
import functools

import jax
import jax.numpy as jnp
from jax.experimental import pallas as pl
from jax.experimental.pallas import tpu as pltpu


# -----------------------------------------------------------------------------
# Kernel 1: fused QKV projection (three outputs, shared resident x block).
# -----------------------------------------------------------------------------
def _qkv_proj_kernel(x_ref, wq_ref, wk_ref, wv_ref, bq_ref, bk_ref, bv_ref,
                     q_ref, k_ref, v_ref):
    """x_ref: (1, T, H) bf16; w*_ref: (H, TN) bf16; b*_ref: (1, TN) f32."""
    x = x_ref[0]
    q = jnp.dot(x, wq_ref[...], preferred_element_type=jnp.float32) + bq_ref[...]
    k = jnp.dot(x, wk_ref[...], preferred_element_type=jnp.float32) + bk_ref[...]
    v = jnp.dot(x, wv_ref[...], preferred_element_type=jnp.float32) + bv_ref[...]
    q_ref[0] = q.astype(q_ref.dtype)
    k_ref[0] = k.astype(k_ref.dtype)
    v_ref[0] = v.astype(v_ref.dtype)


# -----------------------------------------------------------------------------
# Kernel 2: flash attention (all heads per grid step) + fused Wo projection.
#   grid = (B, num_q_tiles, num_kv_tiles); scalar-prefetched skip flags.
# -----------------------------------------------------------------------------
def _flash_attn_kernel(flags_ref, q_ref, k_ref, v_ref, maskb_ref, wo_ref, bo_ref,
                       o_ref, m_sc, l_sc, acc_sc, *, num_heads, head_dim):
    b = pl.program_id(0)
    kv = pl.program_id(2)
    n_kv = pl.num_programs(2)

    # Reset the per-head online-softmax state at the start of the KV loop.
    @pl.when(kv == 0)
    def _init():
        m_sc[...] = jnp.full(m_sc.shape, -jnp.inf, jnp.float32)
        l_sc[...] = jnp.zeros(l_sc.shape, jnp.float32)
        acc_sc[...] = jnp.zeros(acc_sc.shape, jnp.float32)

    # Skip KV tiles that contain no attended key (padding tails, masked spans);
    # their contribution through the -1e30 path is exactly ~0 anyway.
    @pl.when(flags_ref[b, kv] != 0)
    def _compute():
        bias = maskb_ref[0]                                 # (1, TK) f32
        for h in range(num_heads):                          # unrolled head loop
            lo = h * head_dim
            qh = q_ref[0, :, lo:lo + head_dim]              # (TQ, hd) bf16, pre-scaled
            kh = k_ref[0, :, lo:lo + head_dim]              # (TK, hd) bf16
            vh = v_ref[0, :, lo:lo + head_dim]              # (TK, hd) bf16

            # scores: (TQ, TK) with f32 accumulation on the MXU.
            s = jax.lax.dot_general(qh, kh, (((1,), (1,)), ((), ())),
                                    preferred_element_type=jnp.float32)
            s = s + bias

            # Online (flash) softmax update, f32 math.
            m_prev = m_sc[h]                                # (TQ, 1)
            m_new = jnp.maximum(m_prev, jnp.max(s, axis=-1, keepdims=True))
            alpha = jnp.exp(m_prev - m_new)
            p = jnp.exp(s - m_new)
            l_sc[h] = alpha * l_sc[h] + jnp.sum(p, axis=-1, keepdims=True)
            acc_sc[h] = alpha * acc_sc[h] + jnp.dot(
                p.astype(vh.dtype), vh, preferred_element_type=jnp.float32)
            m_sc[h] = m_new

    # End of the KV loop: normalize every head and fold into the Wo projection
    # so the stored output block is lane-dense at width H.
    @pl.when(kv == n_kv - 1)
    def _finalize():
        out = jnp.zeros((o_ref.shape[1], o_ref.shape[2]), jnp.float32)
        for h in range(num_heads):
            lo = h * head_dim
            attn = acc_sc[h] * pl.reciprocal(l_sc[h], approx=True)   # (TQ, hd)
            out = out + jnp.dot(attn.astype(wo_ref.dtype),
                                wo_ref[lo:lo + head_dim, :],
                                preferred_element_type=jnp.float32)
        o_ref[0] = (out + bo_ref[...]).astype(o_ref.dtype)


# -----------------------------------------------------------------------------
# Tile / VMEM selection (per-generation).
# -----------------------------------------------------------------------------
def _vmem_budget_bytes():
    try:
        cap = pltpu.get_tpu_info().vmem_capacity_bytes
    except Exception:
        cap = 64 * 1024 * 1024
    # ~75% of physical VMEM (48 MiB on v7x, 96 MiB on v5e/v6e), capped.
    return min(int(cap * 3 // 4), 100 * 1024 * 1024)


def _attn_footprint(tile, H, num_heads, head_dim, out_itemsize):
    f = 2 * tile * H * 2                       # q double buffer (bf16)
    f += 2 * 2 * tile * H * 2                  # k + v double buffers (bf16)
    f += 2 * tile * H * out_itemsize           # output double buffer
    f += H * H * 2 + H * 4                     # resident Wo + bo
    f += 2 * tile * 4                          # mask-bias buffer
    # scratch: m, l ((NH, tile, 1) padded to 128 lanes) + acc (NH, tile, hd).
    f += num_heads * tile * (2 * 128 + max(head_dim, 128)) * 4
    return f


def _choose_seq_tile(S, H, num_heads, head_dim, out_itemsize, budget):
    cands = []
    if S <= 512:
        cands.append(S)                        # single tile, no padding
    for t in (512, 256, 128):
        if t < S:
            cands.append(t)
    for t in cands:
        if _attn_footprint(t, H, num_heads, head_dim, out_itemsize) <= budget:
            return t
    return cands[-1]


def _choose_col_tile(H):
    if H <= 512:
        return H
    for tn in (512, 384, 256, 128):
        if H % tn == 0:
            return tn
    return H


# -----------------------------------------------------------------------------
# Wrapper.
# -----------------------------------------------------------------------------
def sdpa_bidirectional_attention(x, mask, params, *, num_heads: int):
    """x: [B, S, H] f32; mask: [B, S] bool (True = attend) or None."""
    B, S, H = x.shape
    assert H % num_heads == 0, "hidden_dim must be divisible by num_heads"
    head_dim = H // num_heads
    assert head_dim % 8 == 0, "head_dim must be a multiple of 8 (sublane tiling)"

    vmem_limit = _vmem_budget_bytes()
    tile = _choose_seq_tile(S, H, num_heads, head_dim, x.dtype.itemsize, vmem_limit)
    Sp = pl.cdiv(S, tile) * tile
    n_s = Sp // tile

    # ---- pad sequence, build mask bias (f32!) and per-tile skip flags --------
    x_p = x if Sp == S else jnp.pad(x, ((0, 0), (0, Sp - S), (0, 0)))
    attend = jnp.ones((B, S), dtype=jnp.bool_) if mask is None else mask
    if Sp != S:
        attend = jnp.pad(attend, ((0, 0), (0, Sp - S)), constant_values=False)
    mask_bias = jnp.where(attend, 0.0, -1e30).astype(jnp.float32).reshape(B, 1, Sp)
    kv_flags = jnp.any(attend.reshape(B, n_s, tile), axis=-1).astype(jnp.int32)

    # ---- parameters: bf16 MXU operands, 1/sqrt(hd) baked into Wq/bq ----------
    scale = 1.0 / math.sqrt(head_dim)
    wq = (params["wq"] * scale).astype(jnp.bfloat16)
    wk = params["wk"].astype(jnp.bfloat16)
    wv = params["wv"].astype(jnp.bfloat16)
    wo = params["wo"].astype(jnp.bfloat16)
    bq = (params["bq"] * scale).reshape(1, H).astype(jnp.float32)
    bk = params["bk"].reshape(1, H).astype(jnp.float32)
    bv = params["bv"].reshape(1, H).astype(jnp.float32)
    bo = params["bo"].reshape(1, H).astype(jnp.float32)
    x_bf = x_p.astype(jnp.bfloat16)

    # ---- kernel 1: QKV projection (column-tiled weights, 3 outputs) ----------
    tn = _choose_col_tile(H)
    n_col = H // tn
    proj_cost = pl.CostEstimate(
        flops=int(2 * B * Sp * H * 3 * H),
        transcendentals=0,
        bytes_accessed=int(n_col * B * Sp * H * 2 + B * 3 * H * H * 2
                           + 3 * H * 4 + 3 * B * Sp * H * 2))
    q, k, v = pl.pallas_call(
        _qkv_proj_kernel,
        out_shape=tuple(jax.ShapeDtypeStruct((B, Sp, H), jnp.bfloat16)
                        for _ in range(3)),
        grid=(B, n_col, n_s),
        in_specs=[
            pl.BlockSpec((1, tile, H), lambda b, j, i: (b, i, 0)),   # x
            pl.BlockSpec((H, tn), lambda b, j, i: (0, j)),           # Wq (scaled)
            pl.BlockSpec((H, tn), lambda b, j, i: (0, j)),           # Wk
            pl.BlockSpec((H, tn), lambda b, j, i: (0, j)),           # Wv
            pl.BlockSpec((1, tn), lambda b, j, i: (0, j)),           # bq (scaled)
            pl.BlockSpec((1, tn), lambda b, j, i: (0, j)),           # bk
            pl.BlockSpec((1, tn), lambda b, j, i: (0, j)),           # bv
        ],
        out_specs=[
            pl.BlockSpec((1, tile, tn), lambda b, j, i: (b, i, j)),
            pl.BlockSpec((1, tile, tn), lambda b, j, i: (b, i, j)),
            pl.BlockSpec((1, tile, tn), lambda b, j, i: (b, i, j)),
        ],
        compiler_params=pltpu.CompilerParams(
            dimension_semantics=("parallel", "arbitrary", "arbitrary"),
            vmem_limit_bytes=vmem_limit),
        cost_estimate=proj_cost,
    )(x_bf, wq, wk, wv, bq, bk, bv)

    # ---- kernel 2: flash attention (all heads per step) + fused Wo -----------
    attn_cost = pl.CostEstimate(
        flops=int(4 * B * Sp * Sp * H + 2 * B * Sp * H * H),
        transcendentals=int(B * num_heads * Sp * Sp),
        bytes_accessed=int(B * Sp * H * 2 + 2 * n_s * B * Sp * H * 2
                           + B * Sp * 4 + H * H * 2 + H * 4
                           + B * Sp * H * x.dtype.itemsize))

    grid_spec = pltpu.PrefetchScalarGridSpec(
        num_scalar_prefetch=1,
        grid=(B, n_s, n_s),
        in_specs=[
            pl.BlockSpec((1, tile, H), lambda b, qi, kv, flags: (b, qi, 0)),  # q
            pl.BlockSpec((1, tile, H), lambda b, qi, kv, flags: (b, kv, 0)),  # k
            pl.BlockSpec((1, tile, H), lambda b, qi, kv, flags: (b, kv, 0)),  # v
            pl.BlockSpec((1, 1, tile), lambda b, qi, kv, flags: (b, 0, kv)),  # bias
            pl.BlockSpec((H, H), lambda b, qi, kv, flags: (0, 0)),            # Wo (resident)
            pl.BlockSpec((1, H), lambda b, qi, kv, flags: (0, 0)),            # bo
        ],
        out_specs=pl.BlockSpec((1, tile, H), lambda b, qi, kv, flags: (b, qi, 0)),
        scratch_shapes=[
            pltpu.VMEM((num_heads, tile, 1), jnp.float32),          # running max m
            pltpu.VMEM((num_heads, tile, 1), jnp.float32),          # running sum l
            pltpu.VMEM((num_heads, tile, head_dim), jnp.float32),   # per-head acc
        ],
    )
    out = pl.pallas_call(
        functools.partial(_flash_attn_kernel,
                          num_heads=num_heads, head_dim=head_dim),
        out_shape=jax.ShapeDtypeStruct((B, Sp, H), x.dtype),
        grid_spec=grid_spec,
        compiler_params=pltpu.CompilerParams(
            dimension_semantics=("parallel", "parallel", "arbitrary"),
            vmem_limit_bytes=vmem_limit),
        cost_estimate=attn_cost,
    )(kv_flags, q, k, v, mask_bias, wo, bo)

    return out if Sp == S else out[:, :S, :]


# -----------------------------------------------------------------------------
# Pure-JAX reference (matches the PyTorch module semantics, f32).
# -----------------------------------------------------------------------------
def _reference(x, mask, params, *, num_heads: int):
    B, S, H = x.shape
    hd = H // num_heads
    q = x @ params["wq"] + params["bq"]
    k = x @ params["wk"] + params["bk"]
    v = x @ params["wv"] + params["bv"]
    q = q.reshape(B, S, num_heads, hd).transpose(0, 2, 1, 3)
    k = k.reshape(B, S, num_heads, hd).transpose(0, 2, 1, 3)
    v = v.reshape(B, S, num_heads, hd).transpose(0, 2, 1, 3)
    s = jnp.einsum("bhqd,bhkd->bhqk", q, k) / math.sqrt(hd)
    if mask is not None:
        s = jnp.where(mask.reshape(B, 1, 1, S), s, -1e30)
    p = jax.nn.softmax(s, axis=-1)
    o = jnp.einsum("bhqk,bhkd->bhqd", p, v)
    o = o.transpose(0, 2, 1, 3).reshape(B, S, H)
    return o @ params["wo"] + params["bo"]


def init_params(key, hidden_dim: int):
    """Deterministic nn.Linear-style init (uniform +/- 1/sqrt(fan_in))."""
    bound = 1.0 / math.sqrt(hidden_dim)
    keys = jax.random.split(key, 8)
    u = lambda k, shape: jax.random.uniform(k, shape, jnp.float32, -bound, bound)
    return {
        "wq": u(keys[0], (hidden_dim, hidden_dim)), "bq": u(keys[1], (hidden_dim,)),
        "wk": u(keys[2], (hidden_dim, hidden_dim)), "bk": u(keys[3], (hidden_dim,)),
        "wv": u(keys[4], (hidden_dim, hidden_dim)), "bv": u(keys[5], (hidden_dim,)),
        "wo": u(keys[6], (hidden_dim, hidden_dim)), "bo": u(keys[7], (hidden_dim,)),
    }


if __name__ == "__main__":
    B, S, H, NH = 2, 8, 32, 4

    root = jax.random.PRNGKey(0)
    k_x, k_m, k_p = jax.random.split(root, 3)

    x = jax.random.normal(k_x, (B, S, H), dtype=jnp.float32)
    # boolean mask: True = attend; guarantee at least the first token attends.
    mask = jax.random.bernoulli(k_m, p=0.8, shape=(B, S))
    mask = mask.at[:, 0].set(True)

    params = init_params(k_p, H)

    out = sdpa_bidirectional_attention(x, mask, params, num_heads=NH)
    out = jax.block_until_ready(out)
    assert out.shape == (B, S, H)

    # Reference with bf16-rounded operands (kernel feeds the MXU bf16 inputs).
    rnd = lambda a: a.astype(jnp.bfloat16).astype(jnp.float32)
    params_r = {k: (rnd(v) if k.startswith("w") else v) for k, v in params.items()}
    ref_bf16 = _reference(rnd(x), mask, params_r, num_heads=NH)
    ref_f32 = _reference(x, mask, params, num_heads=NH)

    err_bf16 = float(jnp.max(jnp.abs(out - ref_bf16)))
    err_f32 = float(jnp.max(jnp.abs(out - ref_f32)))
    assert jnp.allclose(out, ref_bf16, atol=2e-2, rtol=2e-2), \
        f"bf16-ref max abs err {err_bf16}"
    assert jnp.allclose(out, ref_f32, atol=5e-2, rtol=5e-2), \
        f"f32-ref max abs err {err_f32}"

    print("KERNEL_OK")
</pallas_src>

<mosaic_0001>
module attributes {stable_mosaic.version = 11 : i64} {
  func.func @_qkv_proj_kernel(%arg0: i32, %arg1: i32, %arg2: i32, %arg3: memref<1x8x32xbf16, #tpu.memory_space<vmem>>, %arg4: memref<32x32xbf16, #tpu.memory_space<vmem>>, %arg5: memref<32x32xbf16, #tpu.memory_space<vmem>>, %arg6: memref<32x32xbf16, #tpu.memory_space<vmem>>, %arg7: memref<1x32xf32, #tpu.memory_space<vmem>>, %arg8: memref<1x32xf32, #tpu.memory_space<vmem>>, %arg9: memref<1x32xf32, #tpu.memory_space<vmem>>, %arg10: memref<1x8x32xbf16, #tpu.memory_space<vmem>>, %arg11: memref<1x8x32xbf16, #tpu.memory_space<vmem>>, %arg12: memref<1x8x32xbf16, #tpu.memory_space<vmem>>) attributes {dimension_semantics = [#tpu.dimension_semantics<parallel>, #tpu.dimension_semantics<arbitrary>, #tpu.dimension_semantics<arbitrary>], iteration_bounds = array<i64: 2, 1, 1>, scalar_prefetch = 0 : i64, scratch_operands = 0 : i64, tpu.core_type = #tpu.core_type<tc>, window_params = [{transform_indices = @transform_0, window_bounds = array<i64: 1, 8, 32>}, {transform_indices = @transform_1, window_bounds = array<i64: 32, 32>}, {transform_indices = @transform_2, window_bounds = array<i64: 32, 32>}, {transform_indices = @transform_3, window_bounds = array<i64: 32, 32>}, {transform_indices = @transform_4, window_bounds = array<i64: 1, 32>}, {transform_indices = @transform_5, window_bounds = array<i64: 1, 32>}, {transform_indices = @transform_6, window_bounds = array<i64: 1, 32>}, {transform_indices = @transform_7, window_bounds = array<i64: 1, 8, 32>}, {transform_indices = @transform_8, window_bounds = array<i64: 1, 8, 32>}, {transform_indices = @transform_9, window_bounds = array<i64: 1, 8, 32>}]} {
    %c0 = arith.constant 0 : index
    %c0_0 = arith.constant 0 : index
    %c0_1 = arith.constant 0 : index
    %0 = vector.load %arg3[%c0, %c0_0, %c0_1] : memref<1x8x32xbf16, #tpu.memory_space<vmem>>, vector<1x8x32xbf16>
    %1 = vector.shape_cast %0 : vector<1x8x32xbf16> to vector<8x32xbf16>
    %c0_2 = arith.constant 0 : index
    %c0_3 = arith.constant 0 : index
    %2 = vector.load %arg4[%c0_2, %c0_3] : memref<32x32xbf16, #tpu.memory_space<vmem>>, vector<32x32xbf16>
    %cst = arith.constant dense<0.000000e+00> : vector<8x32xf32>
    %3 = tpu.matmul %1, %2, %cst {dimension_numbers = #tpu.dot_dimension_numbers<[1], [0], [0], [1], [0, 0, 1, 1], [], []>} : vector<8x32xbf16>, vector<32x32xbf16>, vector<8x32xf32> -> vector<8x32xf32>
    %c0_4 = arith.constant 0 : index
    %c0_5 = arith.constant 0 : index
    %4 = vector.load %arg7[%c0_4, %c0_5] : memref<1x32xf32, #tpu.memory_space<vmem>>, vector<1x32xf32>
    %5 = vector.broadcast %4 : vector<1x32xf32> to vector<8x32xf32>
    %6 = arith.addf %3, %5 : vector<8x32xf32>
    %c0_6 = arith.constant 0 : index
    %c0_7 = arith.constant 0 : index
    %7 = vector.load %arg5[%c0_6, %c0_7] : memref<32x32xbf16, #tpu.memory_space<vmem>>, vector<32x32xbf16>
    %cst_8 = arith.constant dense<0.000000e+00> : vector<8x32xf32>
    %8 = tpu.matmul %1, %7, %cst_8 {dimension_numbers = #tpu.dot_dimension_numbers<[1], [0], [0], [1], [0, 0, 1, 1], [], []>} : vector<8x32xbf16>, vector<32x32xbf16>, vector<8x32xf32> -> vector<8x32xf32>
    %c0_9 = arith.constant 0 : index
    %c0_10 = arith.constant 0 : index
    %9 = vector.load %arg8[%c0_9, %c0_10] : memref<1x32xf32, #tpu.memory_space<vmem>>, vector<1x32xf32>
    %10 = vector.broadcast %9 : vector<1x32xf32> to vector<8x32xf32>
    %11 = arith.addf %8, %10 : vector<8x32xf32>
    %c0_11 = arith.constant 0 : index
    %c0_12 = arith.constant 0 : index
    %12 = vector.load %arg6[%c0_11, %c0_12] : memref<32x32xbf16, #tpu.memory_space<vmem>>, vector<32x32xbf16>
    %cst_13 = arith.constant dense<0.000000e+00> : vector<8x32xf32>
    %13 = tpu.matmul %1, %12, %cst_13 {dimension_numbers = #tpu.dot_dimension_numbers<[1], [0], [0], [1], [0, 0, 1, 1], [], []>} : vector<8x32xbf16>, vector<32x32xbf16>, vector<8x32xf32> -> vector<8x32xf32>
    %c0_14 = arith.constant 0 : index
    %c0_15 = arith.constant 0 : index
    %14 = vector.load %arg9[%c0_14, %c0_15] : memref<1x32xf32, #tpu.memory_space<vmem>>, vector<1x32xf32>
    %15 = vector.broadcast %14 : vector<1x32xf32> to vector<8x32xf32>
    %16 = arith.addf %13, %15 : vector<8x32xf32>
    %17 = arith.truncf %6 : vector<8x32xf32> to vector<8x32xbf16>
    %c0_16 = arith.constant 0 : index
    %c0_17 = arith.constant 0 : index
    %c0_18 = arith.constant 0 : index
    %18 = vector.load %arg10[%c0_16, %c0_17, %c0_18] : memref<1x8x32xbf16, #tpu.memory_space<vmem>>, vector<1x8x32xbf16>
    %19 = vector.shape_cast %18 : vector<1x8x32xbf16> to vector<8x32xbf16>
    %20 = vector.shape_cast %17 : vector<8x32xbf16> to vector<1x8x32xbf16>
    tpu.vector_store %arg10[%c0_16, %c0_17, %c0_18], %20 {strides = array<i32>} : memref<1x8x32xbf16, #tpu.memory_space<vmem>>, vector<1x8x32xbf16>,
    %21 = arith.truncf %11 : vector<8x32xf32> to vector<8x32xbf16>
    %c0_19 = arith.constant 0 : index
    %c0_20 = arith.constant 0 : index
    %c0_21 = arith.constant 0 : index
    %22 = vector.load %arg11[%c0_19, %c0_20, %c0_21] : memref<1x8x32xbf16, #tpu.memory_space<vmem>>, vector<1x8x32xbf16>
    %23 = vector.shape_cast %22 : vector<1x8x32xbf16> to vector<8x32xbf16>
    %24 = vector.shape_cast %21 : vector<8x32xbf16> to vector<1x8x32xbf16>
    tpu.vector_store %arg11[%c0_19, %c0_20, %c0_21], %24 {strides = array<i32>} : memref<1x8x32xbf16, #tpu.memory_space<vmem>>, vector<1x8x32xbf16>,
    %25 = arith.truncf %16 : vector<8x32xf32> to vector<8x32xbf16>
    %c0_22 = arith.constant 0 : index
    %c0_23 = arith.constant 0 : index
    %c0_24 = arith.constant 0 : index
    %26 = vector.load %arg12[%c0_22, %c0_23, %c0_24] : memref<1x8x32xbf16, #tpu.memory_space<vmem>>, vector<1x8x32xbf16>
    %27 = vector.shape_cast %26 : vector<1x8x32xbf16> to vector<8x32xbf16>
    %28 = vector.shape_cast %25 : vector<8x32xbf16> to vector<1x8x32xbf16>
    tpu.vector_store %arg12[%c0_22, %c0_23, %c0_24], %28 {strides = array<i32>} : memref<1x8x32xbf16, #tpu.memory_space<vmem>>, vector<1x8x32xbf16>,
    return
  }
  func.func @transform_0(%arg0: i32, %arg1: i32, %arg2: i32) -> (i32, i32, i32) {
    %c0_i32 = arith.constant 0 : i32
    %c0_i32_0 = arith.constant 0 : i32
    return %arg0, %arg2, %c0_i32 : i32, i32, i32
  }
  func.func @transform_1(%arg0: i32, %arg1: i32, %arg2: i32) -> (i32, i32) {
    %c0_i32 = arith.constant 0 : i32
    %c0_i32_0 = arith.constant 0 : i32
    return %c0_i32, %arg1 : i32, i32
  }
  func.func @transform_2(%arg0: i32, %arg1: i32, %arg2: i32) -> (i32, i32) {
    %c0_i32 = arith.constant 0 : i32
    %c0_i32_0 = arith.constant 0 : i32
    return %c0_i32, %arg1 : i32, i32
  }
  func.func @transform_3(%arg0: i32, %arg1: i32, %arg2: i32) -> (i32, i32) {
    %c0_i32 = arith.constant 0 : i32
    %c0_i32_0 = arith.constant 0 : i32
    return %c0_i32, %arg1 : i32, i32
  }
  func.func @transform_4(%arg0: i32, %arg1: i32, %arg2: i32) -> (i32, i32) {
    %c0_i32 = arith.constant 0 : i32
    %c0_i32_0 = arith.constant 0 : i32
    return %c0_i32, %arg1 : i32, i32
  }
  func.func @transform_5(%arg0: i32, %arg1: i32, %arg2: i32) -> (i32, i32) {
    %c0_i32 = arith.constant 0 : i32
    %c0_i32_0 = arith.constant 0 : i32
    return %c0_i32, %arg1 : i32, i32
  }
  func.func @transform_6(%arg0: i32, %arg1: i32, %arg2: i32) -> (i32, i32) {
    %c0_i32 = arith.constant 0 : i32
    %c0_i32_0 = arith.constant 0 : i32
    return %c0_i32, %arg1 : i32, i32
  }
  func.func @transform_7(%arg0: i32, %arg1: i32, %arg2: i32) -> (i32, i32, i32) {
    %c0_i32 = arith.constant 0 : i32
    return %arg0, %arg2, %arg1 : i32, i32, i32
  }
  func.func @transform_8(%arg0: i32, %arg1: i32, %arg2: i32) -> (i32, i32, i32) {
    %c0_i32 = arith.constant 0 : i32
    return %arg0, %arg2, %arg1 : i32, i32, i32
  }
  func.func @transform_9(%arg0: i32, %arg1: i32, %arg2: i32) -> (i32, i32, i32) {
    %c0_i32 = arith.constant 0 : i32
    return %arg0, %arg2, %arg1 : i32, i32, i32
  }
}

</mosaic_0001>

<bundles_post_ra>
// kernel: tpu_custom_call.1
= control target key start
LH: loop header
LB: loop body
LE: loop exit
PB: predicated region body
PF: predicated region fallthrough
CT: control target
= control target key end

     0   :  { %s1763_s0 = inlined_call_operand.hbm [shape: bf16[2,8,32], index: 0, kind: input, shape index: {}]   ;;  %s1764_s1 = inlined_call_operand.hbm [shape: bf16[32,32], index: 1, kind: input, shape index: {}]   ;;  %s1765_s2 = inlined_call_operand.hbm [shape: bf16[32,32], index: 2, kind: input, shape index: {}]   ;;  %s1766_s3 = inlined_call_operand.hbm [shape: bf16[32,32], index: 3, kind: input, shape index: {}]   ;;  %s1767_s4 = inlined_call_operand.vmem [shape: f32[1,32], index: 4, kind: input, shape index: {}]   ;;  %s1768_s5 = inlined_call_operand.vmem [shape: f32[1,32], index: 5, kind: input, shape index: {}]   ;;  %s1769_s6 = inlined_call_operand.vmem [shape: f32[1,32], index: 6, kind: input, shape index: {}]   ;;  %s1770_s7 = inlined_call_operand.hbm [shape: bf16[2,8,32], index: 7, kind: output, shape index: {0}]   ;;  %s1771_s8 = inlined_call_operand.hbm [shape: bf16[2,8,32], index: 8, kind: output, shape index: {1}]   ;;  %s1772_s9 = inlined_call_operand.hbm [shape: bf16[2,8,32], index: 9, kind: output, shape index: {2}]  }
   0x1   :  { %1778 = sst [smem:[#allocation21_spill]] %s1764_s1 }
   0x2   :  { %1779 = sst [smem:[#allocation22_spill]] %s1765_s2 }
   0x3   :  { %1780 = sst [smem:[#allocation23_spill]] %s1766_s3 }
   0x4   :  { %15 = vsyncpa [#allocation3], 0 }
   0x5   :  { %17 = vsyncpa [#allocation3 + $0x1], 0 }
   0x6   :  { %18 = vsyncpa [#allocation6], 0 }
   0x7   :  { %19 = vsyncpa [#allocation9], 0 }
   0x8   :  { %20 = vsyncpa [#allocation4], 0 }
   0x9   :  { %22 = vsyncpa [#allocation4 + $0x1], 0 }
   0xa   :  { %23 = vsyncpa [#allocation12], 0 }
   0xb   :  { %25 = vsyncpa [#allocation12 + $0x1], 0  ;;  %s1484_s30 = smov 0   ;;  %s1486_s10 = smov 0  }
   0xc   :  { %s1488_s11 = smov 0   ;;  %s1490_s12 = smov 0  }
   0xd   :  { %s1492_s13 = smov 0   ;;  %s1494_s14 = smov 0  }
   0xe LB: > { %s1515_s15 = sadd.s32 4294967295, %s1421_s14   ;;  %s1774_s16 = sadd.s32 4294967294, %s1421_s14   ;;  %s1421_s14 = sphi %s1494_s14, %s31_s14   ;;  %s1417_s13 = sphi %s1492_s13, %s1808_s13   ;;  %s1413_s12 = sphi %s1490_s12, %s1807_s12   ;;  %s1409_s11 = sphi %s1488_s11, %s1806_s11   ;;  %s1405_s10 = sphi %s1486_s10, %s1805_s10   ;;  %s1401_s30 = sphi %s1484_s30, %s1804_s30  }
   0xf   : > { %p72_p0 = scmp.ne.s32.totalorder %s1405_s10, %s1401_s30  ;;  %p1773_p1 = scmp.eq.s32.totalorder %s1515_s15, 0 }
  0x10   : > { %p262_p3 = scmp.eq.s32.totalorder %s1774_s16, 1  ;;  %p987_p5 = scmp.ge.s32.totalorder %s1421_s14, 1 }
  0x11   : > { %p1526_p4 = por %p1773_p1, %p72_p0  ;;  %p329_p7 = scmp.lt.s32.totalorder %s1421_s14, 3 }
  0x12   : > { %p1531_p6 = por %p262_p3, %p72_p0  ;;  %s1423_s20 = smov [#allocation5]  }
  0x13   : > { %s1781_s17 = scalar_select %p1526_p4, 1, 0 }
  0x14   : > { %s1782_s18 = scalar_select %p1531_p6, 1, 0 }
  0x15   : > { %p1536_p8 = pnand %p987_p5, %p329_p7  ;;  %s343_s21 = sshll.u32 %s1423_s20, 4  ;;  %s344_s21 = int_to_ptr.vmem [resolvable:$true] %s343_s21 }
  0x16   : > { %1783 = sst [smem:[#allocation19_spill]] %s1782_s18  ;;  %s1424_s23 = smov [#allocation7]  }
  0x17   : > { %p1078_p9 = pneg %p1536_p8  ;;  %s358_s24 = sshll.u32 %s1424_s23, 4  ;;  %s359_s24 = int_to_ptr.vmem [resolvable:$true] %s358_s24 }
  0x18   : > { %s1425_s25 = smov [#allocation8]   ;;  %s1182_s27 = scalar_lea.vmem %s344_s21, 256 }
  0x19   : > { %p1545_p11 = pnand %p1078_p9, %p1773_p1  ;;  %s373_s26 = sshll.u32 %s1425_s25, 4  ;;  %s374_s26 = int_to_ptr.vmem [resolvable:$true] %s373_s26 }
  0x1a   : > { %p1183_p13 = scmp.ne.s32.totalorder %s344_s21, %s1182_s27  ;;  %p1190_p5 = scmp.lt.s32.totalorder %s344_s21, %s344_s21 }
  0x1b   : > { %p1173_p12 = pneg %p1545_p11  ;;  %p1191_p7 = scmp.lt.s32.totalorder %s1182_s27, %s1182_s27 }
  0x1d   : > { %p1185_p0 = pnand %p1183_p13, %p1173_p12  ;;  %p1192_p9 = por %p1191_p7, %p1190_p5 }
  0x1f   : > { %p1186_p3 = pneg %p1185_p0 }
  0x21   : > { %p1193_p10 = pnand %p1192_p9, %p1186_p3 }
  0x23   : > { %1196 = shalt.err (!%p1193_p10)
}
  0x24   : > { %s1426_s28 = smov 64   ;;  %s1427_s29 = smov 4  }
  0x25   : > { %s1786_s1 = sld [smem:[#allocation21_spill]]  ;;  %s1208_s25 = scalar_lea.vmem %s359_s24, 256 }
  0x26   : > { %p1209_p1 = scmp.ne.s32.totalorder %s359_s24, %s1208_s25  ;;  %p1216_p2 = scmp.lt.s32.totalorder %s359_s24, %s359_s24 }
  0x27   : > { %p1217_p6 = scmp.lt.s32.totalorder %s1208_s25, %s1208_s25 }
  0x28   : > { %p1211_p13 = pnand %p1209_p1, %p1173_p12 }
  0x29   : > { %p1218_p5 = por %p1217_p6, %p1216_p2 }
  0x2a   : > { %p1212_p0 = pneg %p1211_p13 }
  0x2b   : > { %1081 = dma.hbm_to_vmem [thread:$0]  (!%p1545_p11), %s1786_s1, 256, %s344_s21, [#allocation6], %s1426_s28, %s1426_s28, %s1427_s29  }
  0x2c   : > { %p1219_p3 = pnand %p1218_p5, %p1212_p0 }
  0x2e   : > { %1222 = shalt.err (!%p1219_p3)
}
  0x2f   : > { %s1787_s2 = sld [smem:[#allocation22_spill]]  ;;  %s1234_s21 = scalar_lea.vmem %s374_s26, 256 }
  0x30   : > { %p1235_p10 = scmp.ne.s32.totalorder %s374_s26, %s1234_s21  ;;  %p1242_p9 = scmp.lt.s32.totalorder %s374_s26, %s374_s26 }
  0x31   : > { %p1243_p13 = scmp.lt.s32.totalorder %s1234_s21, %s1234_s21 }
  0x32   : > { %p1237_p7 = pnand %p1235_p10, %p1173_p12 }
  0x33   : > { %p1244_p4 = por %p1243_p13, %p1242_p9 }
  0x34   : > { %p1238_p1 = pneg %p1237_p7 }
  0x35   : > { %1084 = dma.hbm_to_vmem [thread:$0]  (!%p1545_p11), %s1787_s2, 256, %s359_s24, [#allocation6], %s1426_s28, %s1426_s28, %s1427_s29  }
  0x36   : > { %p1245_p2 = pnand %p1244_p4, %p1238_p1 }
  0x38   : > { %1248 = shalt.err (!%p1245_p2)
}
  0x39   : > { %s1788_s3 = sld [smem:[#allocation23_spill]]  ;;  %s59_s16 = sadd.s32 1, %s1409_s11 }
  0x3a   : > { %s50_s24 = sadd.s32 1, %s1417_s13  ;;  %p66_p4 = scmp.ne.s32.totalorder %s1409_s11, %s1405_s10 }
  0x3b   : > { %p52_p6 = scmp.ge.s32.totalorder %s50_s24, 2  ;;  %p67_p12 = scmp.eq.s32.totalorder %s1421_s14, 0 }
  0x3c   : > { %p1789_p0 = scmp.eq.s32.totalorder %s1515_s15, 1  ;;  %p1105_p3 = scmp.lt.s32.totalorder %s1421_s14, 2 }
  0x3d   : > { %s1810_s24 = smov (%p52_p6, %s50_s24), 0  ;;  %p68_p10 = por %p67_p12, %p66_p4 }
  0x3e   : > { %p1582_p5 = por %p1789_p0, %p66_p4  ;;  %1791 = sst [smem:[#allocation20_spill]] %s1810_s24 }
  0x3f   : > { %1087 = dma.hbm_to_vmem [thread:$0]  (!%p1545_p11), %s1788_s3, 256, %s374_s26, [#allocation9], %s1426_s28, %s1426_s28, %s1427_s29  }
  0x40   : > { %s405_s25 = sand.u32 1, %s1409_s11   ;;  %s54_s27 = ssub.s32 %s1417_s13, %s1810_s24 }
  0x41   : > { %p57_p7 = scmp.eq.s32.totalorder %s54_s27, 0  ;;  %s995_s26 = sshll.u32 %s405_s25, 2 }
  0x42   : > { %s996_s28 = sshll.u32 %s1417_s13, 6  ;;  %s409_s1 = scalar_lea.vmem [#allocation2], %s995_s26 }
  0x43   : > { %s1594_s29 = scalar_select %p57_p7, %s1409_s11, %s59_s16  }
  0x44   : > { %s415_s23 = scalar_lea.hbm %s1763_s0, %s996_s28  ;;  %s417_s2 = sshll.u32 %s409_s1, 4  ;;  %s418_s2 = int_to_ptr.vmem [resolvable:$true] %s417_s2 }
  0x45   : > { %p1601_p11 = pnand %p1105_p3, %p68_p10  ;;  %s406_s18 = scalar_lea.sflag [#allocation3], %s405_s25 }
  0x46   : > { %s1262_s27 = scalar_lea.vmem %s418_s2, 64  ;;  %s1428_s16 = smov [#allocation2]  }
  0x47   : > { %p1251_p1 = pneg %p1601_p11  ;;  %p1263_p9 = scmp.ne.s32.totalorder %s418_s2, %s1262_s27 }
  0x48   : > { %s1267_s24 = sshll.u32 %s1428_s16, 4  ;;  %s1268_s24 = int_to_ptr.vmem [resolvable:$false] %s1267_s24 }
  0x49   : > { %p1265_p13 = pnand %p1263_p9, %p1251_p1  ;;  %s1269_s28 = scalar_lea.vmem %s1268_s24, 128 }
  0x4a   : > { %p1270_p4 = scmp.lt.s32.totalorder %s418_s2, %s1268_s24  ;;  %p1271_p6 = scmp.lt.s32.totalorder %s1269_s28, %s1262_s27 }
  0x4b   : > { %p1266_p2 = pneg %p1265_p13 }
  0x4c   : > { %p1272_p12 = por %p1271_p6, %p1270_p4 }
  0x4e   : > { %p1273_p0 = pnand %p1272_p12, %p1266_p2 }
  0x50   : > { %1276 = shalt.err (!%p1273_p0)
}
  0x51   : > { %1091 = dma.hbm_to_vmem [thread:$0]  (!%p1601_p11), %s415_s23, 64, %s418_s2, %s406_s18  }
  0x52   : > { %426 = sbr.rel (%p1536_p8) target bundleno = 362 (0x16a), region = 48  ;;  %s1612_s1 = sand.u32 (!%p1536_p8), 1, %s1405_s10  }
  0x53   : > { %s1615_s25 = sshll.u32 (!%p1536_p8), %s1612_s1, 2  ;;  %s429_s24 = scalar_lea.sflag (!%p1536_p8), [#allocation3], %s1612_s1 }
  0x54   : > { %s432_s26 = scalar_lea.vmem (!%p1536_p8), [#allocation2], %s1615_s25  ;;  %p1793_p3 = scmp.ne.s32.totalorder (!%p1536_p8), %s1781_s17, 0 }
  0x57   : > { %1380 = dma.done.wait (%p1793_p3), %s429_s24, 64  }
  0x58   : > { %1382 = vsyncadd (%p1793_p3), %s429_s24, 4294967232  ;;  %p1794_p10 = scmp.eq.s32.totalorder %s1515_s15, 0 }
  0x5a   : > { %1384 = dma.done.wait (%p1794_p10), [#allocation6], 512   ;;  %p1795_p8 = pmov %p1794_p10 }
  0x5c   : > { %1386 = vsyncadd (%p1795_p8), [#allocation6], 4294966784  ;;  %p1796_p7 = pmov %p1795_p8 }
  0x5e   : > { %1388 = dma.done.wait (%p1796_p7), [#allocation9], 256   ;;  %p1797_p11 = pmov %p1796_p7 }
  0x5f   : > { %v1429_v0 = vmov 0.0   ;;  %vm1430_vm0 = vmmov 0   ;;  %v1165_v1 = vld [vmem:[#allocation5 + $0x8] sm:$0xff]   ;;  %v1166_v2 = vld [vmem:[#allocation7 + $0x8] sm:$0xff]   ;;  %v1167_v3 = vld [vmem:[#allocation5] sm:$0xff]   ;;  %vm532_vm1 = vcmask 261120  }
  0x60   : > { %1390 = vsyncadd (%p1797_p11), [#allocation9], 4294967040  ;;  %1034 = vmatprep.subr.bf16.mxu0 %v1429_v0  ;;  %1042 = vmatprep.subr.bf16.mxu1 %v1429_v0  ;;  %v1168_v4 = vld [vmem:[#allocation7] sm:$0xff]   ;;  %v508_v5 = vld [vmem:[%s432_s26] sm:$0xf]  ;;  %s1642_s21 = sshll.u32 %s1413_s12, 6 }
  0x61   : > { %1038 = vmatprep.mubr.msk.bf16.mxu0 %vm1430_vm0, %v1429_v0  ;;  %1046 = vmatprep.mubr.msk.bf16.mxu1 %vm1430_vm0, %v1429_v0  ;;  %v1169_v6 = vld [vmem:[#allocation8 + $0x8] sm:$0xff]   ;;  %v1170_v7 = vld [vmem:[#allocation8] sm:$0xff]   ;;  %v1005_v8 = vld [vmem:[%s1767_s4] ss:$0 sm:$0xff]  ;;  %s483_s20 = scalar_lea.vmem [#allocation10], %s1615_s25  ;;  %s490_s27 = scalar_lea.vmem [#allocation11], %s1615_s25 }
  0x62   : > { %1035 = vmatpush3.bf16.msra.mxu0 %v1165_v1  ;;  %1043 = vmatpush3.bf16.msra.mxu1 %v1166_v2  ;;  %v1009_v9 = vld [vmem:[%s1768_s5] ss:$0 sm:$0xff]  ;;  %s735_s23 = sshll.u32 %s483_s20, 4  ;;  %s750_s16 = sshll.u32 %s490_s27, 4  ;;  %vm703_vm2 = vcmask 257024   ;;  %s1652_s23 = int_to_ptr.vmem [resolvable:$true] %s735_s23  ;;  %s1660_s16 = int_to_ptr.vmem [resolvable:$true] %s750_s16 }
  0x63   : > { %1036 = vmatprep.subr.bf16.mxu0 %v1429_v0  ;;  %1044 = vmatprep.subr.bf16.mxu1 %v1429_v0  ;;  %s1650_s12 = scalar_lea.hbm %s1770_s7, %s1642_s21  ;;  %s1658_s3 = scalar_lea.hbm %s1771_s8, %s1642_s21  ;;  %v1013_v21 = vld [vmem:[%s1769_s6] ss:$0 sm:$0xff] }
  0x64   : > { %s710_s28 = scalar_lea.sflag [#allocation4], %s1612_s1  ;;  %s1277_s24 = scalar_lea.vmem %s1652_s23, 64 }
  0x65   : > { %p1278_p1 = scmp.ne.s32.totalorder %s1652_s23, %s1277_s24  ;;  %s1431_s26 = smov [#allocation10]  }
  0x66   : > { %1037 = vmatpush3.bf16.msra.mxu0 %v1167_v3  ;;  %1045 = vmatpush3.bf16.msra.mxu1 %v1168_v4  ;;  %s1281_s2 = sshll.u32 %s1431_s26, 4  ;;  %s1282_s2 = int_to_ptr.vmem [resolvable:$false] %s1281_s2 }
  0x67   : > { %1050 = vmatprep.subr.bf16.mxu0 %v1429_v0  ;;  %p1279_p9 = pnand %p1278_p1, %p1582_p5  ;;  %s1283_s19 = scalar_lea.vmem %s1282_s2, 128 }
  0x68   : > { %p1284_p2 = scmp.lt.s32.totalorder %s1652_s23, %s1282_s2  ;;  %p1285_p4 = scmp.lt.s32.totalorder %s1283_s19, %s1277_s24 }
  0x69   : > { %1039 = vmatmul.mubr.msk.bf16.vlgmr.msra.gmra.mxu0 %vm532_vm1, %v508_v5  ;;  %1047 = vmatmul.mubr.msk.bf16.vlgmr.msra.gmra.mxu1 %vm532_vm1, %v508_v5  ;;  %p1280_p13 = pneg %p1279_p9 }
  0x6a   : > { %1051 = vmatpush3.bf16.msra.mxu0 %v1169_v6  ;;  %1054 = vmatprep.mubr.msk.bf16.mxu0 %vm1430_vm0, %v1429_v0  ;;  %p1286_p6 = por %p1285_p4, %p1284_p2 }
  0x6b   : > { %1052 = vmatprep.subr.bf16.mxu0 %v1429_v0 }
  0x6c   : > { %p1287_p12 = pnand %p1286_p6, %p1280_p13 }
  0x6e   : > { %1053 = vmatpush3.bf16.msra.mxu0 %v1170_v7 }
  0x71   : > { %1055 = vmatmul.mubr.msk.bf16.vlgmr.msra.gmra.mxu0 %vm532_vm1, %v508_v5 }
 0x129   : > { %v570_v10 = vpop.f32.mrf.mxu0  ;;  %v633_v12 = vpop.f32.mrf.mxu1 }
 0x12a   : > { %v571_v11 = vadd.f32 %v1005_v8, %v570_v10  ;;  %v634_v14 = vadd.f32 %v1009_v9, %v633_v12 }
 0x12b   : > { %v1040_v13 = vpop.f32.mrf.mxu0  ;;  %v1048_v16 = vpop.f32.mrf.mxu1 }
 0x12c   : > { %v702_v15 = vpack.c.bf16 %v571_v11, %v571_v11  ;;  %v705_v17 = vpack.c.bf16 %v634_v14, %v634_v14 }
 0x12d   : > { %v573_v18 = vpop.f32.mrf.mxu0  ;;  %v636_v19 = vpop.f32.mrf.mxu1 }
 0x12e   : > { %704 = vst.msk [vmem:[%s483_s20] sm:$0xf] %vm703_vm2, %v702_v15  ;;  %706 = vst.msk [vmem:[%s490_s27] sm:$0xf] %vm703_vm2, %v705_v17 }
 0x12f   : > { %v1041_v20 = vpop.f32.mrf.mxu0 }
 0x130   : > { %1290 = shalt.err (!%p1287_p12)
}
 0x131   : > { %s1291_s20 = scalar_lea.hbm %s1650_s12, 64  ;;  %s1295_s17 = scalar_lea.hbm %s1770_s7, 128 }
 0x132   : > { %p1292_p0 = scmp.ne.s32.totalorder %s1650_s12, %s1291_s20  ;;  %p1296_p8 = scmp.lt.s32.totalorder %s1650_s12, %s1770_s7 }
 0x133   : > { %p1297_p7 = scmp.lt.s32.totalorder %s1295_s17, %s1291_s20 }
 0x134   : > { %p1293_p3 = pnand %p1292_p0, %p1582_p5 }
 0x135   : > { %p1298_p11 = por %p1297_p7, %p1296_p8 }
 0x136   : > { %p1294_p10 = pneg %p1293_p3 }
 0x138   : > { %p1299_p1 = pnand %p1298_p11, %p1294_p10 }
 0x13a   : > { %1302 = shalt.err (!%p1299_p1)
}
 0x13b   : > { %1072 = dma.vmem_to_hbm [thread:$0]  (%p1582_p5), %s1652_s23, 64, %s1650_s12, %s710_s28   ;;  %v1049_v22 = vpop.f32.mrf.mxu1 }
 0x13c   : > { %s1798_s19 = sand.u32 1, %s1515_s15   ;;  %s1303_s2 = scalar_lea.vmem %s1660_s16, 64 }
 0x13d   : > { %s1690_s24 = scalar_lea.sflag [#allocation12], %s1798_s19  ;;  %p1304_p9 = scmp.ne.s32.totalorder %s1660_s16, %s1303_s2 }
 0x13e   : > { %s1432_s20 = smov [#allocation11]  }
 0x13f   : > { %p1305_p13 = pnand %p1304_p9, %p1582_p5  ;;  %s1307_s1 = sshll.u32 %s1432_s20, 4  ;;  %s1308_s1 = int_to_ptr.vmem [resolvable:$false] %s1307_s1 }
 0x140   : > { %s1309_s27 = scalar_lea.vmem %s1308_s1, 128  ;;  %p1310_p4 = scmp.lt.s32.totalorder %s1660_s16, %s1308_s1 }
 0x141   : > { %p1306_p2 = pneg %p1305_p13  ;;  %p1311_p6 = scmp.lt.s32.totalorder %s1309_s27, %s1303_s2 }
 0x143   : > { %p1312_p12 = por %p1311_p6, %p1310_p4 }
 0x145   : > { %p1313_p0 = pnand %p1312_p12, %p1306_p2 }
 0x147   : > { %1316 = shalt.err (!%p1313_p0)
}
 0x148   : > { %s1317_s15 = scalar_lea.hbm %s1658_s3, 64  ;;  %s1321_s28 = scalar_lea.hbm %s1771_s8, 128 }
 0x149   : > { %p1318_p3 = scmp.ne.s32.totalorder %s1658_s3, %s1317_s15  ;;  %p1322_p7 = scmp.lt.s32.totalorder %s1658_s3, %s1771_s8 }
 0x14a   : > { %p1323_p11 = scmp.lt.s32.totalorder %s1321_s28, %s1317_s15 }
 0x14b   : > { %p1319_p10 = pnand %p1318_p3, %p1582_p5 }
 0x14c   : > { %p1324_p1 = por %p1323_p11, %p1322_p7 }
 0x14d   : > { %p1320_p8 = pneg %p1319_p10 }
 0x14f   : > { %p1325_p9 = pnand %p1324_p1, %p1320_p8 }
 0x151   : > { %1328 = shalt.err (!%p1325_p9)
}
 0x152   : > { %1073 = dma.vmem_to_hbm [thread:$0]  (%p1582_p5), %s1660_s16, 64, %s1658_s3, %s1690_s24   ;;  %v696_v23 = vpop.f32.mrf.mxu0 }
 0x153   : > { %s497_s26 = scalar_lea.vmem [#allocation13], %s1615_s25  ;;  %v697_v24 = vadd.f32 %v1013_v21, %v696_v23  ;;  %s1718_s1 = scalar_lea.hbm %s1772_s9, %s1642_s21 }
 0x154   : > { %s765_s19 = sshll.u32 %s497_s26, 4  ;;  %v1056_v25 = vpop.f32.mrf.mxu0  ;;  %s1433_s25 = smov [#allocation13]   ;;  %s766_s19 = int_to_ptr.vmem [resolvable:$true] %s765_s19 }
 0x155   : > { %v707_v26 = vpack.c.bf16 %v697_v24, %v697_v24  ;;  %s1329_s27 = scalar_lea.vmem %s766_s19, 64  ;;  %s1333_s16 = sshll.u32 %s1433_s25, 4  ;;  %s1334_s16 = int_to_ptr.vmem [resolvable:$false] %s1333_s16 }
 0x156   : > { %v699_v27 = vpop.f32.mrf.mxu0  ;;  %p1330_p13 = scmp.ne.s32.totalorder %s766_s19, %s1329_s27  ;;  %s1335_s3 = scalar_lea.vmem %s1334_s16, 128 }
 0x157   : > { %708 = vst.msk [vmem:[%s497_s26] sm:$0xf] %vm703_vm2, %v707_v26  ;;  %p1336_p6 = scmp.lt.s32.totalorder %s766_s19, %s1334_s16  ;;  %p1337_p12 = scmp.lt.s32.totalorder %s1335_s3, %s1329_s27 }
 0x158   : > { %v1057_v28 = vpop.f32.mrf.mxu0  ;;  %p1331_p2 = pnand %p1330_p13, %p1582_p5 }
 0x159   : > { %p1338_p0 = por %p1337_p12, %p1336_p6 }
 0x15a   : > { %p1332_p4 = pneg %p1331_p2 }
 0x15c   : > { %p1339_p3 = pnand %p1338_p0, %p1332_p4 }
 0x15e   : > { %1342 = shalt.err (!%p1339_p3)
}
 0x15f   : > { %s1343_s21 = scalar_lea.hbm %s1718_s1, 64  ;;  %s1347_s12 = scalar_lea.hbm %s1772_s9, 128 }
 0x160   : > { %p1344_p10 = scmp.ne.s32.totalorder %s1718_s1, %s1343_s21  ;;  %p1348_p11 = scmp.lt.s32.totalorder %s1718_s1, %s1772_s9 }
 0x161   : > { %p1349_p1 = scmp.lt.s32.totalorder %s1347_s12, %s1343_s21 }
 0x162   : > { %p1345_p8 = pnand %p1344_p10, %p1582_p5 }
 0x163   : > { %p1350_p9 = por %p1349_p1, %p1348_p11 }
 0x164   : > { %p1346_p7 = pneg %p1345_p8 }
 0x166   : > { %p1351_p13 = pnand %p1350_p9, %p1346_p7 }
 0x168   : > { %1354 = shalt.err (!%p1351_p13)
}
 0x169   : > { %1074 = dma.vmem_to_hbm [thread:$0]  (%p1582_p5), %s766_s19, 64, %s1718_s1, %s1690_s24  }
 0x16a PF: > { %s1799_s18 = sld [smem:[#allocation19_spill]]  ;;  %s777_s26 = sand.u32 1, %s1401_s30  }
 0x16b   : > { %p1801_p4 = scmp.ge.s32.totalorder %s1421_s14, 2  ;;  %s778_s2 = scalar_lea.sflag [#allocation4], %s777_s26 }
 0x170   : > { %p1800_p2 = scmp.ne.s32.totalorder %s1799_s18, 0 }
 0x172   : > { %p1093_p6 = pnand %p1801_p4, %p1800_p2 }
 0x174   : > { %p1094_p12 = pneg %p1093_p6 }
 0x176   : > { %1392 = dma.done.wait (%p1094_p12), %s778_s2, 64  }
 0x177   : > { %1394 = vsyncadd (%p1094_p12), %s778_s2, 4294967232  ;;  %s1802_s20 = sadd.s32 4294967294, %s1421_s14  }
 0x178   : > { %s786_s27 = sand.u32 1, %s1802_s20  }
 0x179   : > { %s787_s25 = scalar_lea.sflag [#allocation12], %s786_s27 }
 0x17a   : > { %1396 = dma.done.wait (%p1094_p12), %s787_s25, 128  }
 0x17b   : > { %1398 = vsyncadd (%p1094_p12), %s787_s25, 4294967168  ;;  %s31_s14 = sadd.s32 1, %s1421_s14   ;;  %s1803_s22 = sld [smem:[#allocation20_spill]] }
 0x17c   : > { %p28_p5 = scmp.ge.s32.totalorder %s31_s14, 4   ;;  %s1804_s30 = smov %s1405_s10 }
 0x17d   : > { %s1805_s10 = smov %s1409_s11  ;;  %s1806_s11 = smov %s1594_s29 }
 0x17e   : > { %s1807_s12 = smov %s1417_s13  ;;  %30 = sbr.rel (!%p28_p5) target bundleno = 14 (0xe), region = 149 }
 0x181   : > { %s1808_s13 = smov %s1803_s22 }
 0x183   :  { %801 = vsyncpa [#allocation3], 1 }
 0x184   :  { %803 = vsyncpa [#allocation3 + $0x1], 1 }
 0x185   :  { %804 = vsyncpa [#allocation6], 1 }
 0x186   :  { %805 = vsyncpa [#allocation9], 1 }
 0x187   :  { %806 = vsyncpa [#allocation4], 1 }
 0x188   :  { %808 = vsyncpa [#allocation4 + $0x1], 1 }
 0x189   :  { %809 = vsyncpa [#allocation12], 1 }
 0x18a   :  { %811 = vsyncpa [#allocation12 + $0x1], 1 }

</bundles_post_ra>
